<compile_context>
chip_gen: v7x
topology: tpu7x:2x2x1
jax: 0.10.0
libtpu: 0.0.40
codegen_flags: <defaults>
</compile_context>

<pallas_src>
import jax
import jax.numpy as jnp
from jax import lax
from jax.experimental import pallas as pl
from jax.experimental.pallas import tpu as pltpu


def _round_up(x, m):
    return ((x + m - 1) // m) * m


def _cdiv(a, b):
    return (a + b - 1) // b


def _vmem_capacity_bytes():
    try:
        return int(pltpu.get_tpu_info().vmem_capacity_bytes)
    except Exception:
        return 64 * 1024 * 1024  # conservative fallback (v7x per-TensorCore)


def _select_tiles(B, C, HW, itemsize, x_budget):
    """Pick (tb, tc, thw) so one x block's *padded* VMEM footprint <= x_budget."""
    pack = 8 * (4 // itemsize)          # sublane packing: 8 f32, 16 bf16, 32 int8

    if B < pack:
        tb = B                          # block == full batch dim (always legal)
    else:
        cap = 256 if B >= 256 else 128
        tb = min(_round_up(B, pack), cap)

    def buf_bytes(tb_, tc_, thw_):
        # Real VMEM footprint of one buffered x block (padded layout).
        return tb_ * _round_up(tc_, pack) * _round_up(thw_, 128) * itemsize

    min_tc = C if C <= pack else pack

    # Shrink the batch tile if even a minimal channel sliver (full HW) is too big.
    while tb > pack and buf_bytes(tb, min_tc, HW) > x_budget:
        tb = max(_round_up(tb // 2, pack), pack)

    if buf_bytes(tb, min_tc, HW) > x_budget:
        # Very large spatial maps: tile the HW axis as a second reduction axis.
        tc = min_tc
        thw = max((x_budget // (tb * _round_up(tc, pack) * itemsize)) // 128 * 128,
                  128)
        thw = min(thw, _round_up(HW, 128))
        return tb, tc, thw

    thw = HW
    if C <= pack:
        tc = C
    else:
        max_rows = x_budget // (tb * _round_up(thw, 128) * itemsize)
        tc = (max_rows // pack) * pack
        if tc >= C:
            tc = C                      # full channel dim in one block
        elif tc >= 512:
            tc = (tc // 256) * 256      # MXU-friendly alignment when roomy
        tc = max(tc, pack)
    return tb, tc, thw


def _make_kernel(C, HW, tc, thw, mask_c, mask_hw, slice_weight):
    def kernel(x_ref, w_ref, b_ref, o_ref, acc_ref):
        # x_ref:   (TB, TC, THW)    native dtype
        # w_ref:   (C_PAD|TC, NUM)  f32, pre-transposed, pre-scaled by 1/(H*W)
        # b_ref:   (1, NUM)         f32
        # o_ref:   (TB, NUM)        output dtype
        # acc_ref: (TB, NUM)        f32 accumulator, persists across (c, hw) axes
        k = pl.program_id(1)
        h = pl.program_id(2)

        @pl.when(jnp.logical_and(k == 0, h == 0))
        def _init():
            # Fold the bias into the accumulator init (saves a VPU pass later).
            acc_ref[...] = jnp.broadcast_to(b_ref[...], acc_ref.shape)

        xv = x_ref[...]                                           # (TB, TC, THW)
        if mask_hw:
            hw_ids = h * thw + lax.broadcasted_iota(jnp.int32, xv.shape, 2)
            xv = jnp.where(hw_ids < HW, xv, jnp.zeros((), xv.dtype))

        # Spatial partial sum; accumulate in f32 without a full-tile f32 copy.
        pooled = jnp.sum(xv, axis=-1, dtype=jnp.float32)          # (TB, TC)
        if mask_c:
            c_ids = k * tc + lax.broadcasted_iota(jnp.int32, pooled.shape, 1)
            pooled = jnp.where(c_ids < C, pooled, 0.0)

        if slice_weight:
            w_tile = w_ref[pl.ds(pl.multiple_of(k * tc, tc), tc), :]
        else:
            w_tile = w_ref[...]
        acc_ref[...] += jnp.dot(pooled, w_tile,
                                preferred_element_type=jnp.float32)

        @pl.when(jnp.logical_and(k == pl.num_programs(1) - 1,
                                 h == pl.num_programs(2) - 1))
        def _finalize():
            o_ref[...] = acc_ref[...].astype(o_ref.dtype)

    return kernel


def local_classifier(x, weight, bias):
    """x: (B, C, H, W) NCHW; weight: (num_classes, C); bias: (num_classes,)."""
    B, C, H, W = x.shape
    HW = H * W
    num_classes, in_features = weight.shape
    assert in_features == C

    itemsize = jnp.dtype(x.dtype).itemsize
    pack = 8 * (4 // itemsize)

    vmem_cap = _vmem_capacity_bytes()
    # Per-buffer budget for the streamed activation tile (double-buffered).
    if vmem_cap <= 80 * 1024 * 1024:        # v7x-class (64 MiB VMEM / TC)
        x_budget = 8 * 1024 * 1024
    else:                                   # v5e / v6e (128 MiB VMEM)
        x_budget = 20 * 1024 * 1024

    tb, tc, thw = _select_tiles(B, C, HW, itemsize, x_budget)

    b_grid = _cdiv(B, tb)
    c_grid = _cdiv(C, tc)
    hw_grid = _cdiv(HW, thw)
    b_out = b_grid * tb
    c_pad = c_grid * tc
    num_pad = max(_round_up(num_classes, 128), 128)

    mask_c = (tc < C) and (C % tc != 0)
    mask_hw = (thw < HW) and (HW % thw != 0)

    # Keep the whole weight VMEM-resident (fetched once) unless it is huge.
    weight_resident = (2 * _round_up(c_pad, 8) * num_pad * 4) <= max(
        vmem_cap // 4, 8 * 1024 * 1024)
    slice_weight = weight_resident and c_grid > 1

    # Plain-XLA glue: view-only reshape of x (NO padding copy of the activation);
    # only the tiny params get padded (zero channels / classes contribute zero).
    x_flat = x.reshape(B, C, HW)
    w_t = weight.astype(jnp.float32).T / float(HW)                 # (C, NUM)
    w_t = jnp.pad(w_t, ((0, c_pad - C), (0, num_pad - num_classes)))
    b2d = jnp.pad(bias.astype(jnp.float32).reshape(1, num_classes),
                  ((0, 0), (0, num_pad - num_classes)))

    if weight_resident:
        w_spec = pl.BlockSpec((c_pad, num_pad), lambda i, k, h: (0, 0))
    else:
        w_spec = pl.BlockSpec((tc, num_pad), lambda i, k, h: (k, 0))

    grid_spec = pltpu.PrefetchScalarGridSpec(
        num_scalar_prefetch=0,
        grid=(b_grid, c_grid, hw_grid),
        in_specs=[
            pl.BlockSpec((tb, tc, thw), lambda i, k, h: (i, k, h)),
            w_spec,
            pl.BlockSpec((1, num_pad), lambda i, k, h: (0, 0)),
        ],
        out_specs=pl.BlockSpec((tb, num_pad), lambda i, k, h: (i, 0)),
        scratch_shapes=[pltpu.VMEM((tb, num_pad), jnp.float32)],
    )

    cost = pl.CostEstimate(
        flops=2 * B * C * num_classes + B * C * HW,
        transcendentals=0,
        bytes_accessed=(B * C * HW * itemsize
                        + c_pad * num_pad * 4 * (1 if weight_resident else b_grid)
                        + num_pad * 4
                        + B * num_classes * itemsize),
    )

    kernel = _make_kernel(C, HW, tc, thw, mask_c, mask_hw, slice_weight)

    out_padded = pl.pallas_call(
        kernel,
        out_shape=jax.ShapeDtypeStruct((b_out, num_pad), x.dtype),
        grid_spec=grid_spec,
        compiler_params=pltpu.CompilerParams(
            dimension_semantics=("parallel", "arbitrary", "arbitrary"),
            vmem_limit_bytes=int(vmem_cap * 3 // 4),
        ),
        cost_estimate=cost,
    )(x_flat, w_t, b2d)

    return out_padded[:B, :num_classes]


if __name__ == "__main__":
    # Small shapes consistent with the module's forward.
    B, C, H, W = 2, 4, 16, 16
    num_classes = 10

    key = jax.random.PRNGKey(0)
    kx, kw, kb = jax.random.split(key, 3)

    x = jax.random.normal(kx, (B, C, H, W), dtype=jnp.float32)
    bound = 1.0 / (C ** 0.5)
    weight = jax.random.uniform(kw, (num_classes, C), minval=-bound, maxval=bound,
                                dtype=jnp.float32)
    bias = jax.random.uniform(kb, (num_classes,), minval=-bound, maxval=bound,
                              dtype=jnp.float32)

    out = jax.block_until_ready(local_classifier(x, weight, bias))

    # Reference check in plain JAX.
    ref = jnp.mean(x, axis=(2, 3)) @ weight.T + bias
    assert out.shape == (B, num_classes)
    assert jnp.allclose(out, ref, atol=1e-5, rtol=1e-5), "mismatch vs reference"

    print("KERNEL_OK")
</pallas_src>

<mosaic_0001>
module attributes {stable_mosaic.version = 11 : i64} {
  func.func @kernel(%arg0: i32, %arg1: i32, %arg2: i32, %arg3: memref<2x4x256xf32, #tpu.memory_space<vmem>>, %arg4: memref<4x128xf32, #tpu.memory_space<vmem>>, %arg5: memref<1x128xf32, #tpu.memory_space<vmem>>, %arg6: memref<2x128xf32, #tpu.memory_space<vmem>>, %arg7: memref<2x128xf32, #tpu.memory_space<vmem>>) attributes {dimension_semantics = [#tpu.dimension_semantics<parallel>, #tpu.dimension_semantics<arbitrary>, #tpu.dimension_semantics<arbitrary>], iteration_bounds = array<i64: 1, 1, 1>, scalar_prefetch = 0 : i64, scratch_operands = 1 : i64, tpu.core_type = #tpu.core_type<tc>, window_params = [{transform_indices = @transform_0, window_bounds = array<i64: 2, 4, 256>}, {pipeline_mode = #tpu.pipeline_mode<synchronous>, transform_indices = @transform_1, window_bounds = array<i64: 4, 128>}, {pipeline_mode = #tpu.pipeline_mode<synchronous>, transform_indices = @transform_2, window_bounds = array<i64: 1, 128>}, {transform_indices = @transform_3, window_bounds = array<i64: 2, 128>}]} {
    %c0_i32 = arith.constant 0 : i32
    %0 = arith.cmpi eq, %arg1, %c0_i32 : i32
    %c0_i32_0 = arith.constant 0 : i32
    %1 = arith.cmpi eq, %arg2, %c0_i32_0 : i32
    %2 = arith.andi %0, %1 : i1
    %3 = arith.extui %2 : i1 to i32
    %c0_i32_1 = arith.constant 0 : i32
    %4 = arith.cmpi ne, %3, %c0_i32_1 : i32
    scf.if %4 {
      %c0_14 = arith.constant 0 : index
      %c0_15 = arith.constant 0 : index
      %17 = vector.load %arg5[%c0_14, %c0_15] : memref<1x128xf32, #tpu.memory_space<vmem>>, vector<1x128xf32>
      %18 = vector.shape_cast %17 : vector<1x128xf32> to vector<1x128xf32>
      %19 = vector.broadcast %18 : vector<1x128xf32> to vector<2x128xf32>
      %c0_16 = arith.constant 0 : index
      %c0_17 = arith.constant 0 : index
      %20 = vector.load %arg7[%c0_16, %c0_17] : memref<2x128xf32, #tpu.memory_space<vmem>>, vector<2x128xf32>
      tpu.vector_store %arg7[%c0_16, %c0_17], %19 {strides = array<i32>} : memref<2x128xf32, #tpu.memory_space<vmem>>, vector<2x128xf32>,
    } else {
    }
    %c0 = arith.constant 0 : index
    %c0_2 = arith.constant 0 : index
    %c0_3 = arith.constant 0 : index
    %5 = vector.load %arg3[%c0, %c0_2, %c0_3] : memref<2x4x256xf32, #tpu.memory_space<vmem>>, vector<2x4x256xf32>
    %cst = arith.constant dense<0.000000e+00> : vector<2x4xf32>
    %6 = vector.multi_reduction <add>, %5, %cst [2] : vector<2x4x256xf32> to vector<2x4xf32>
    %c0_4 = arith.constant 0 : index
    %c0_5 = arith.constant 0 : index
    %7 = vector.load %arg4[%c0_4, %c0_5] : memref<4x128xf32, #tpu.memory_space<vmem>>, vector<4x128xf32>
    %c0_6 = arith.constant 0 : index
    %c0_7 = arith.constant 0 : index
    %8 = vector.load %arg7[%c0_6, %c0_7] : memref<2x128xf32, #tpu.memory_space<vmem>>, vector<2x128xf32>
    %cst_8 = arith.constant dense<0.000000e+00> : vector<2x128xf32>
    %9 = tpu.matmul %6, %7, %cst_8 {dimension_numbers = #tpu.dot_dimension_numbers<[1], [0], [0], [1], [0, 0, 1, 1], [], []>} : vector<2x4xf32>, vector<4x128xf32>, vector<2x128xf32> -> vector<2x128xf32>
    %10 = arith.addf %8, %9 : vector<2x128xf32>
    %c0_9 = arith.constant 0 : index
    %c0_10 = arith.constant 0 : index
    %11 = vector.load %arg7[%c0_9, %c0_10] : memref<2x128xf32, #tpu.memory_space<vmem>>, vector<2x128xf32>
    tpu.vector_store %arg7[%c0_9, %c0_10], %10 {strides = array<i32>} : memref<2x128xf32, #tpu.memory_space<vmem>>, vector<2x128xf32>,
    %c0_i32_11 = arith.constant 0 : i32
    %12 = arith.cmpi eq, %arg1, %c0_i32_11 : i32
    %c0_i32_12 = arith.constant 0 : i32
    %13 = arith.cmpi eq, %arg2, %c0_i32_12 : i32
    %14 = arith.andi %12, %13 : i1
    %15 = arith.extui %14 : i1 to i32
    %c0_i32_13 = arith.constant 0 : i32
    %16 = arith.cmpi ne, %15, %c0_i32_13 : i32
    scf.if %16 {
      %c0_14 = arith.constant 0 : index
      %c0_15 = arith.constant 0 : index
      %17 = vector.load %arg7[%c0_14, %c0_15] : memref<2x128xf32, #tpu.memory_space<vmem>>, vector<2x128xf32>
      %c0_16 = arith.constant 0 : index
      %c0_17 = arith.constant 0 : index
      %18 = vector.load %arg6[%c0_16, %c0_17] : memref<2x128xf32, #tpu.memory_space<vmem>>, vector<2x128xf32>
      tpu.vector_store %arg6[%c0_16, %c0_17], %17 {strides = array<i32>} : memref<2x128xf32, #tpu.memory_space<vmem>>, vector<2x128xf32>,
    } else {
    }
    return
  }
  func.func @transform_0(%arg0: i32, %arg1: i32, %arg2: i32) -> (i32, i32, i32) {
    %c0_i32 = arith.constant 0 : i32
    return %arg0, %arg1, %arg2 : i32, i32, i32
  }
  func.func @transform_1(%arg0: i32, %arg1: i32, %arg2: i32) -> (i32, i32) {
    %c0_i32 = arith.constant 0 : i32
    %c0_i32_0 = arith.constant 0 : i32
    %c0_i32_1 = arith.constant 0 : i32
    return %c0_i32, %c0_i32_0 : i32, i32
  }
  func.func @transform_2(%arg0: i32, %arg1: i32, %arg2: i32) -> (i32, i32) {
    %c0_i32 = arith.constant 0 : i32
    %c0_i32_0 = arith.constant 0 : i32
    %c0_i32_1 = arith.constant 0 : i32
    return %c0_i32, %c0_i32_0 : i32, i32
  }
  func.func @transform_3(%arg0: i32, %arg1: i32, %arg2: i32) -> (i32, i32) {
    %c0_i32 = arith.constant 0 : i32
    %c0_i32_0 = arith.constant 0 : i32
    return %arg0, %c0_i32 : i32, i32
  }
}

</mosaic_0001>

<bundles_post_ra>
// kernel: tpu_custom_call.1
= control target key start
LH: loop header
LB: loop body
LE: loop exit
PB: predicated region body
PF: predicated region fallthrough
CT: control target
= control target key end

     0   :  { %8 = vsyncpa [#allocation4], 0  ;;  %s350_s0 = inlined_call_operand.hbm [shape: f32[2,4,256], index: 0, kind: input, shape index: {}]   ;;  %s351_s1 = inlined_call_operand.hbm [shape: f32[4,128], index: 1, kind: input, shape index: {}]   ;;  %s352_s2 = inlined_call_operand.vmem [shape: f32[1,128], index: 2, kind: input, shape index: {}]   ;;  %s353_s3 = inlined_call_operand.hbm [shape: f32[2,128], index: 3, kind: output, shape index: {}]  }
   0x1   :  { %9 = vsyncpa [#allocation7], 0 }
   0x2   :  { %10 = vsyncpa [#allocation5], 0  ;;  %s279_s12 = smov [#allocation3]   ;;  %s207_s16 = scalar_lea.hbm %s350_s0, 256 }
   0x3   :  { %s16_s13 = sshll.u32 %s279_s12, 4  ;;  %p208_p0 = scmp.ne.s32.totalorder %s350_s0, %s207_s16  ;;  %s17_s13 = int_to_ptr.vmem [resolvable:$true] %s16_s13 }
   0x4   :  { %p211_p1 = scmp.lt.u32.totalorder %s207_s16, %s350_s0 }
   0x6   :  { %p213_p2 = pnand %p211_p1, %p208_p0 }
   0x8   :  { %216 = shalt.err (!%p213_p2)
}
   0x9   :  { %s217_s21 = scalar_lea.vmem %s17_s13, 256  ;;  %p222_p4 = scmp.lt.s32.totalorder %s17_s13, %s17_s13 }
   0xa   :  { %p218_p3 = scmp.ne.s32.totalorder %s17_s13, %s217_s21  ;;  %p223_p5 = scmp.lt.s32.totalorder %s217_s21, %s217_s21 }
   0xc   :  { %p224_p6 = por %p223_p5, %p222_p4 }
   0xe   :  { %p225_p7 = pnand %p224_p6, %p218_p3 }
  0x10   :  { %228 = shalt.err (!%p225_p7)
}
  0x11   :  { %s280_s22 = smov 128   ;;  %s281_s23 = smov 8  }
  0x12   :  { %22 = dma.hbm_to_vmem [thread:$0]  %s350_s0, 256, %s17_s13, [#allocation4], %s280_s22, %s280_s22, %s281_s23  }
  0x13   :  { %s282_s26 = smov [#allocation6]   ;;  %s229_s30 = scalar_lea.hbm %s351_s1, 64 }
  0x14   :  { %s29_s27 = sshll.u32 %s282_s26, 4  ;;  %p230_p8 = scmp.ne.s32.totalorder %s351_s1, %s229_s30  ;;  %s30_s27 = int_to_ptr.vmem [resolvable:$true] %s29_s27 }
  0x15   :  { %p233_p9 = scmp.lt.u32.totalorder %s229_s30, %s351_s1 }
  0x17   :  { %p235_p10 = pnand %p233_p9, %p230_p8 }
  0x19   :  { %238 = shalt.err (!%p235_p10)
}
  0x1a   :  { %s239_s8 = scalar_lea.vmem %s30_s27, 64  ;;  %p244_p12 = scmp.lt.s32.totalorder %s30_s27, %s30_s27 }
  0x1b   :  { %p240_p11 = scmp.ne.s32.totalorder %s30_s27, %s239_s8  ;;  %p245_p13 = scmp.lt.s32.totalorder %s239_s8, %s239_s8 }
  0x1d   :  { %p246_p0 = por %p245_p13, %p244_p12 }
  0x1f   :  { %p247_p1 = pnand %p246_p0, %p240_p11 }
  0x21   :  { %250 = shalt.err (!%p247_p1)
}
  0x22   :  { %32 = dma.hbm_to_vmem [thread:$0]  %s351_s1, 64, %s30_s27, [#allocation7]  }
  0x23   :  { %273 = dma.done.wait [#allocation4], 256  }
  0x24   :  { %274 = vsyncadd [#allocation4], 4294967040 }
  0x25   :  { %275 = dma.done.wait [#allocation7], 64  }
  0x26   :  { %276 = vsyncadd [#allocation7], 4294967232  ;;  %vm63_vm0 = vcmask 1043456   ;;  %v55_v0 = vld [vmem:[#allocation3] sm:$0xff]  ;;  %v56_v1 = vld [vmem:[#allocation3 + $0x8] sm:$0xff]  ;;  %v283_v11 = vmov 0.0   ;;  %v78_v13 = vlaneseq }
  0x27   :  { %v59_v2 = vcombine.high %v55_v0, %v55_v0  ;;  %v64_v3 = vsel %vm63_vm0, %v55_v0, 0.0  ;;  %v60_v4 = vcombine.high %v56_v1, %v56_v1  ;;  %v69_v6 = vsel %vm63_vm0, %v56_v1, 0.0  ;;  %v74_v10 = vld [vmem:[#allocation6] sm:$0xf]  ;;  %193 = vmatprep.subr.mxu0 %v283_v11  ;;  %v188_v12 = vld [vmem:[%s352_s2] ss:$0 sm:$0xff] }
  0x28   :  { %vm284_vm1 = vmmov 0   ;;  %194 = vmatpush3.msk.msra.mxu0 %vm63_vm0, %v74_v10  ;;  %54 = vst [vmem:[#allocation2] sm:$0x3] %v188_v12  ;;  %v79_v14 = vand.u32 127, %v78_v13  ;;  %v81_v15 = vshrl.u32 %v78_v13, 7  ;;  %vm88_vm2 = vcmask 1041409  }
  0x29   :  { %v65_v5 = vsel %vm63_vm0, %v59_v2, 0.0  ;;  %v70_v7 = vsel %vm63_vm0, %v60_v4, 0.0  ;;  %195 = vmatprep.mubr.msk.f32.mxu0 %vm284_vm1, %v283_v11  ;;  %vm90_vm3 = vcmask 31744   ;;  %s285_s11 = smov [#allocation8]  }
  0x2a   :  { %v66_v8 = vadd.f32 %v65_v5, %v64_v3  ;;  %v71_v9 = vadd.f32 %v70_v7, %v69_v6  ;;  %v82_v17 = vsub.s32 %v79_v14, %v81_v15  ;;  %s178_s2 = sshll.u32 %s285_s11, 4  ;;  %s179_s2 = int_to_ptr.vmem [resolvable:$true] %s178_s2 }
  0x2b   :  { %s251_s12 = scalar_lea.vmem %s179_s2, 32  ;;  %p256_p3 = scmp.lt.s32.totalorder %s179_s2, %s179_s2 }
  0x2c   :  { %67 = vadd.xlane.f32.xlu0 %v66_v8  ;;  %p252_p2 = scmp.ne.s32.totalorder %s179_s2, %s251_s12  ;;  %p257_p4 = scmp.lt.s32.totalorder %s251_s12, %s251_s12 }
  0x2e   :  { %p258_p5 = por %p257_p4, %p256_p3 }
  0x2f   :  { %v75_v22 = vld [vmem:[#allocation2] sm:$0x3] }
  0x30   :  { %72 = vadd.xlane.f32.xlu0 %v71_v9  ;;  %p259_p6 = pnand %p258_p5, %p252_p2 }
  0xb9   :  { %v68_v16 = vpop.xlane.xlu0 %67 }
  0xba   :  { %v83_v19 = vrot.slane %v68_v16, %v82_v17 }
  0xbd   :  { %v73_v18 = vpop.xlane.xlu0 %72 }
  0xbe   :  { %v87_v20 = vrot.slane %v73_v18, %v82_v17 }
  0xc0   :  { %v89_v21 = vsel %vm88_vm2, %v87_v20, %v83_v19 }
  0xc1   :  { %196 = vmatmul.mubr.msk.f32.vlgmr.msra.gmra.mrb[0].mxu0 %vm90_vm3, %v89_v21 }
 0x194   :  { %v162_v23 = vpop.f32.mrb[0].mxu0 }
 0x195   :  { %v166_v24 = vadd.f32 %v162_v23, %v75_v22  ;;  %v197_v25 = vpop.f32.mrb[1].mxu0 }
 0x197   :  { %167 = vst [vmem:[#allocation2] sm:$0x3] %v166_v24 }
 0x19e   :  { %v170_v26 = vld [vmem:[#allocation2] sm:$0x3] }
 0x19f   :  { %171 = vst [vmem:[#allocation8] sm:$0x3] %v170_v26 }
 0x1a0   :  { %262 = shalt.err (!%p259_p6)
}
 0x1a1   :  { %s263_s15 = scalar_lea.hbm %s353_s3, 32 }
 0x1a2   :  { %p264_p7 = scmp.ne.s32.totalorder %s353_s3, %s263_s15  ;;  %p267_p8 = scmp.lt.u32.totalorder %s263_s15, %s353_s3 }
 0x1a4   :  { %p269_p9 = pnand %p267_p8, %p264_p7 }
 0x1a6   :  { %272 = shalt.err (!%p269_p9)
}
 0x1a7   :  { %181 = dma.vmem_to_hbm [thread:$0]  %s179_s2, 32, %s353_s3, [#allocation5]  }
 0x1a8   :  { %277 = dma.done.wait [#allocation5], 32  }
 0x1a9   :  { %278 = vsyncadd [#allocation5], 4294967264 }
 0x1aa   :  { %185 = vsyncpa [#allocation4], 1 }
 0x1ab   :  { %186 = vsyncpa [#allocation7], 1 }
 0x1ac   :  { %187 = vsyncpa [#allocation5], 1 }

</bundles_post_ra>
